<compile_context>
chip_gen: v5e
topology: v5e:2x2
jax: 0.10.0
libtpu: 0.0.40
codegen_flags: <defaults>
</compile_context>

<pallas_src>
import jax
import jax.numpy as jnp
from jax.experimental import pallas as pl
from jax.experimental.pallas import tpu as pltpu


def _argmax_channel_kernel(x_ref, o_ref):
    """x_ref: (C, tR, 128) float logits in VMEM; o_ref: (tR, 128) int32 indices."""
    c_total = x_ref.shape[0]
    # Load per channel (not the whole block at once) -> ~3 live (tR,128) slabs max.
    best_val = x_ref[0]                                   # (tR, 128)
    best_idx = jnp.zeros(best_val.shape, dtype=jnp.int32)
    # C is a small static constant -> unrolled elementwise compare/select on the
    # VPU (kernel is HBM-bound; these VALU ops are hidden under the DMAs).
    for c in range(1, c_total):
        v = x_ref[c]
        # Strict '>' keeps the FIRST maximal index (torch.argmax tie rule).
        # Extra NaN term: a NaN candidate beats any non-NaN best, and once the
        # best is NaN it sticks -> "first NaN wins", matching torch/jnp argmax.
        take = (v > best_val) | ((v != v) & (best_val == best_val))
        best_val = jnp.where(take, v, best_val)
        best_idx = jnp.where(take, jnp.int32(c), best_idx)
    o_ref[...] = best_idx


def _choose_tile_rows(C: int, r_needed: int, itemsize: int) -> int:
    """Rows-of-128 per tile: ~4 MiB per input buffer, multiple of 8, capped to data."""
    budget_bytes = 4 * 1024 * 1024
    t = budget_bytes // (C * 128 * itemsize)
    t = max(8, (t // 8) * 8)
    cap = ((r_needed + 7) // 8) * 8   # never allocate more rows than the data needs
    return min(t, cap)


def indexed_segmentation_map(x: jax.Array) -> jax.Array:
    """JAX wrapper reproducing IndexedSegmentationMap.forward.

    x: (1, C, H, W) / (C, H, W) (or anything that squeezes to rank>=1) float logits.
    returns: int32 argmax over the leading (channel) axis of the squeezed tensor.
    (PyTorch returns int64; int32 is used here since JAX runs with x64 disabled.)
    """
    x = jnp.squeeze(x)                  # glue: drop singleton dims like torch .squeeze()
    assert x.ndim >= 1, f"expected rank >= 1 after squeeze, got {x.shape}"
    C = x.shape[0]
    spatial_shape = x.shape[1:]

    # Lane-dense relayout: (C, *spatial) -> (C, N) -> pad -> (C, R, 128).
    N = 1
    for d in spatial_shape:
        N *= d
    itemsize = jnp.dtype(x.dtype).itemsize
    r_needed = max(1, -(-N // 128))                   # ceil(N / 128), at least 1 row
    t_rows = _choose_tile_rows(C, r_needed, itemsize)
    R = ((r_needed + t_rows - 1) // t_rows) * t_rows  # grid divides exactly
    n_pad = R * 128

    x_flat = x.reshape(C, N)
    if n_pad != N:
        # Pad value is irrelevant: padded pixels are sliced off before returning.
        x_flat = jnp.pad(x_flat, ((0, 0), (0, n_pad - N)))
    x3 = x_flat.reshape(C, R, 128)

    out2d = pl.pallas_call(
        _argmax_channel_kernel,
        out_shape=jax.ShapeDtypeStruct((R, 128), jnp.int32),
        grid_spec=pl.GridSpec(
            grid=(R // t_rows,),
            in_specs=[pl.BlockSpec((C, t_rows, 128), lambda i: (0, i, 0))],
            out_specs=pl.BlockSpec((t_rows, 128), lambda i: (i, 0)),
        ),
        compiler_params=pltpu.CompilerParams(
            dimension_semantics=("parallel",),
            vmem_limit_bytes=64 << 20,   # headroom for 2x input + 2x output buffers
        ),
    )(x3)

    return out2d.reshape(R * 128)[:N].reshape(spatial_shape)


if __name__ == "__main__":
    key = jax.random.PRNGKey(0)

    # Small shape consistent with "raw logits from the n-channel output convolution".
    B, C, H, W = 1, 4, 16, 16
    x = jax.random.normal(key, (B, C, H, W), dtype=jnp.float32)

    out = indexed_segmentation_map(x)
    out = jax.block_until_ready(out)

    ref = jnp.argmax(jnp.squeeze(x), axis=0).astype(jnp.int32)
    assert out.shape == (H, W), out.shape
    assert out.dtype == jnp.int32, out.dtype
    assert bool(jnp.all(out == ref)), "mismatch vs reference argmax"

    # Second check: odd spatial size (exercises the flatten+pad path) and bf16 logits.
    key2 = jax.random.PRNGKey(0)
    C2, H2, W2 = 6, 33, 47
    x2 = jax.random.normal(key2, (1, C2, H2, W2), dtype=jnp.bfloat16)
    out2 = jax.block_until_ready(indexed_segmentation_map(x2))
    ref2 = jnp.argmax(jnp.squeeze(x2), axis=0).astype(jnp.int32)
    assert out2.shape == (H2, W2), out2.shape
    assert bool(jnp.all(out2 == ref2)), "mismatch vs reference argmax (odd shape)"

    print("KERNEL_OK")
</pallas_src>

<mosaic_0001>
module attributes {stable_mosaic.version = 11 : i64} {
  func.func @_argmax_channel_kernel(%arg0: i32, %arg1: memref<4x8x128xf32, #tpu.memory_space<vmem>>, %arg2: memref<8x128xi32, #tpu.memory_space<vmem>>) attributes {dimension_semantics = [#tpu.dimension_semantics<parallel>], iteration_bounds = array<i64: 1>, scalar_prefetch = 0 : i64, scratch_operands = 0 : i64, tpu.core_type = #tpu.core_type<tc>, window_params = [{transform_indices = @transform_0, window_bounds = array<i64: 4, 8, 128>}, {transform_indices = @transform_1, window_bounds = array<i64: 8, 128>}]} {
    %c0 = arith.constant 0 : index
    %c0_0 = arith.constant 0 : index
    %c0_1 = arith.constant 0 : index
    %0 = vector.load %arg1[%c0, %c0_0, %c0_1] : memref<4x8x128xf32, #tpu.memory_space<vmem>>, vector<1x8x128xf32>
    %1 = vector.shape_cast %0 : vector<1x8x128xf32> to vector<8x128xf32>
    %c0_i32 = arith.constant 0 : i32
    %2 = vector.broadcast %c0_i32 : i32 to vector<8x128xi32>
    %c1 = arith.constant 1 : index
    %c0_2 = arith.constant 0 : index
    %c0_3 = arith.constant 0 : index
    %3 = vector.load %arg1[%c1, %c0_2, %c0_3] : memref<4x8x128xf32, #tpu.memory_space<vmem>>, vector<1x8x128xf32>
    %4 = vector.shape_cast %3 : vector<1x8x128xf32> to vector<8x128xf32>
    %5 = arith.cmpf ogt, %4, %1 : vector<8x128xf32>
    %6 = arith.cmpf one, %4, %4 : vector<8x128xf32>
    %7 = arith.cmpf oeq, %1, %1 : vector<8x128xf32>
    %8 = arith.andi %6, %7 : vector<8x128xi1>
    %9 = arith.ori %5, %8 : vector<8x128xi1>
    %10 = arith.select %9, %4, %1 : vector<8x128xi1>, vector<8x128xf32>
    %c1_i32 = arith.constant 1 : i32
    %11 = vector.broadcast %c1_i32 : i32 to vector<8x128xi32>
    %12 = arith.select %9, %11, %2 : vector<8x128xi1>, vector<8x128xi32>
    %c2 = arith.constant 2 : index
    %c0_4 = arith.constant 0 : index
    %c0_5 = arith.constant 0 : index
    %13 = vector.load %arg1[%c2, %c0_4, %c0_5] : memref<4x8x128xf32, #tpu.memory_space<vmem>>, vector<1x8x128xf32>
    %14 = vector.shape_cast %13 : vector<1x8x128xf32> to vector<8x128xf32>
    %15 = arith.cmpf ogt, %14, %10 : vector<8x128xf32>
    %16 = arith.cmpf one, %14, %14 : vector<8x128xf32>
    %17 = arith.cmpf oeq, %10, %10 : vector<8x128xf32>
    %18 = arith.andi %16, %17 : vector<8x128xi1>
    %19 = arith.ori %15, %18 : vector<8x128xi1>
    %20 = arith.select %19, %14, %10 : vector<8x128xi1>, vector<8x128xf32>
    %c2_i32 = arith.constant 2 : i32
    %21 = vector.broadcast %c2_i32 : i32 to vector<8x128xi32>
    %22 = arith.select %19, %21, %12 : vector<8x128xi1>, vector<8x128xi32>
    %c3 = arith.constant 3 : index
    %c0_6 = arith.constant 0 : index
    %c0_7 = arith.constant 0 : index
    %23 = vector.load %arg1[%c3, %c0_6, %c0_7] : memref<4x8x128xf32, #tpu.memory_space<vmem>>, vector<1x8x128xf32>
    %24 = vector.shape_cast %23 : vector<1x8x128xf32> to vector<8x128xf32>
    %25 = arith.cmpf ogt, %24, %20 : vector<8x128xf32>
    %26 = arith.cmpf one, %24, %24 : vector<8x128xf32>
    %27 = arith.cmpf oeq, %20, %20 : vector<8x128xf32>
    %28 = arith.andi %26, %27 : vector<8x128xi1>
    %29 = arith.ori %25, %28 : vector<8x128xi1>
    %c3_i32 = arith.constant 3 : i32
    %30 = vector.broadcast %c3_i32 : i32 to vector<8x128xi32>
    %31 = arith.select %29, %30, %22 : vector<8x128xi1>, vector<8x128xi32>
    %c0_8 = arith.constant 0 : index
    %c0_9 = arith.constant 0 : index
    %32 = vector.load %arg2[%c0_8, %c0_9] : memref<8x128xi32, #tpu.memory_space<vmem>>, vector<8x128xi32>
    tpu.vector_store %arg2[%c0_8, %c0_9], %31 {strides = array<i32>} : memref<8x128xi32, #tpu.memory_space<vmem>>, vector<8x128xi32>,
    return
  }
  func.func @transform_0(%arg0: i32) -> (i32, i32, i32) {
    %c0_i32 = arith.constant 0 : i32
    %c0_i32_0 = arith.constant 0 : i32
    %c0_i32_1 = arith.constant 0 : i32
    return %c0_i32, %arg0, %c0_i32_0 : i32, i32, i32
  }
  func.func @transform_1(%arg0: i32) -> (i32, i32) {
    %c0_i32 = arith.constant 0 : i32
    %c0_i32_0 = arith.constant 0 : i32
    return %arg0, %c0_i32 : i32, i32
  }
}

</mosaic_0001>

<bundles_post_ra>
// kernel: tpu_custom_call.1
= control target key start
LH: loop header
LB: loop body
LE: loop exit
PB: predicated region body
PF: predicated region fallthrough
CT: control target
= control target key end

     0   :  { %6 = vsyncpa [#allocation3], 0  ;;  %s148_s0 = inlined_call_operand.hbm [shape: f32[4,8,128], index: 0, kind: input, shape index: {}]   ;;  %s149_s1 = inlined_call_operand.hbm [shape: s32[8,128], index: 1, kind: output, shape index: {}]  }
   0x1   :  { %7 = vsyncpa [#allocation4], 0  ;;  %s12_s8 = sshll.u32 %s148_s0, 4  ;;  %s127_s9 = smov [#allocation2]   ;;  %s13_s8 = int_to_ptr.hbm [resolvable:$true] %s12_s8 }
   0x2   :  { %s14_s10 = sshll.u32 %s127_s9, 4  ;;  %s128_s11 = smov 128   ;;  %s15_s10 = int_to_ptr.vmem [resolvable:$true] %s14_s10 }
   0x3   :  { %s129_s12 = smov 8  }
   0x4   :  { %20 = dma.hbm_to_vmem [thread:$0]  %s13_s8, 512, %s15_s10, [#allocation3], %s128_s11, %s128_s11, %s129_s12  }
   0x5   :  { %123 = dma.done.wait [#allocation3], 512  }
   0x6   :  { %124 = vsyncadd [#allocation3], 4294966784  ;;  %v25_v0 = vld [vmem:[#allocation2] sm:$0xff]  ;;  %v27_v1 = vld [vmem:[#allocation2 + $0x8] sm:$0xff]  ;;  %v130_v5 = vmov 0   ;;  %s131_s0 = smov [#allocation5]  }
   0x7   :  { %v36_v2 = vld [vmem:[#allocation2 + $0x10] sm:$0xff]  ;;  %vm28_vm0 = vcmp.gt.f32.partialorder %v27_v1, %v25_v0  ;;  %vm29_vm1 = vcmp.ne.f32.partialorder %v27_v1, %v27_v1  ;;  %vm30_vm2 = vcmp.eq.f32.partialorder %v25_v0, %v25_v0  ;;  %v45_v4 = vld [vmem:[#allocation2 + $0x18] sm:$0xff]  ;;  %s58_s13 = sshll.u32 %s131_s0, 4  ;;  %s60_s16 = sshll.u32 %s149_s1, 4  ;;  %s59_s13 = int_to_ptr.vmem [resolvable:$true] %s58_s13  ;;  %s61_s16 = int_to_ptr.hbm [resolvable:$true] %s60_s16 }
   0x8   :  { %vm31_vm3 = vmand %vm29_vm1, %vm30_vm2  ;;  %vm38_vm5 = vcmp.ne.f32.partialorder %v36_v2, %v36_v2  ;;  %vm47_vm10 = vcmp.ne.f32.partialorder %v45_v4, %v45_v4 }
   0x9   :  { %vm32_vm4 = vmor %vm28_vm0, %vm31_vm3 }
   0xa   :  { %v33_v3 = vsel %vm32_vm4, %v27_v1, %v25_v0  ;;  %v34_v6 = vsel %vm32_vm4, 1, %v130_v5 }
   0xb   :  { %vm37_vm6 = vcmp.gt.f32.partialorder %v36_v2, %v33_v3  ;;  %vm39_vm7 = vcmp.eq.f32.partialorder %v33_v3, %v33_v3 }
   0xc   :  { %vm40_vm8 = vmand %vm38_vm5, %vm39_vm7 }
   0xd   :  { %vm41_vm9 = vmor %vm37_vm6, %vm40_vm8 }
   0xe   :  { %v42_v7 = vsel %vm41_vm9, %v36_v2, %v33_v3  ;;  %v43_v8 = vsel %vm41_vm9, 2, %v34_v6 }
   0xf   :  { %vm46_vm11 = vcmp.gt.f32.partialorder %v45_v4, %v42_v7  ;;  %vm48_vm12 = vcmp.eq.f32.partialorder %v42_v7, %v42_v7 }
  0x10   :  { %vm49_vm13 = vmand %vm47_vm10, %vm48_vm12 }
  0x11   :  { %vm50_vm14 = vmor %vm46_vm11, %vm49_vm13 }
  0x12   :  { %v51_v9 = vsel %vm50_vm14, 3, %v43_v8 }
  0x13   :  { %52 = vst [vmem:[#allocation5] sm:$0xff] %v51_v9 }
  0x14   :  { %63 = dma.vmem_to_hbm [thread:$0]  %s59_s13, 128, %s61_s16, [#allocation4]  }
  0x15   :  { %125 = dma.done.wait [#allocation4], 128  }
  0x16   :  { %126 = vsyncadd [#allocation4], 4294967168 }
  0x17   :  { %68 = vsyncpa [#allocation3], 1 }
  0x18   :  { %69 = vsyncpa [#allocation4], 1 }

</bundles_post_ra>
